<compile_context>
chip_gen: v5e
topology: v5e:2x2
jax: 0.10.0
libtpu: 0.0.40
codegen_flags: <defaults>
</compile_context>

<pallas_src>
import jax
import jax.numpy as jnp
from jax.experimental import pallas as pl
from jax.experimental.pallas import tpu as pltpu

STATES_DIMENTION = 4
ACTIONS_DIMENTION = 4
HIDDEN = 50


def _round_up(n, m):
    return ((n + m - 1) // m) * m


def prepare_params(w1, b1, w2, b2):
    """Transpose weights / reshape biases once per parameter update.

    w1: (50, 4), b1: (50,), w2: (4, 50), b2: (4,)  (PyTorch nn.Linear layout)
    Returns (w1_t (4, 50), b1 (1, 50), w2_t (50, 4), b2 (1, 4)).
    """
    return (jnp.transpose(w1), b1[None, :], jnp.transpose(w2), b2[None, :])


def _net_kernel(x_ref, w1_ref, b1_ref, w2_ref, b2_ref, o_ref):
    # x_ref: (TB, 4), w1_ref: (4, 50), b1_ref: (1, 50),
    # w2_ref: (50, 4), b2_ref: (1, 4)
    h = jnp.dot(x_ref[...], w1_ref[...],
                preferred_element_type=jnp.float32) + b1_ref[...]
    h = jnp.maximum(h, 0.0)
    o_ref[...] = jnp.dot(h, w2_ref[...],
                         preferred_element_type=jnp.float32) + b2_ref[...]


def _net_argmax_kernel(x_ref, w1_ref, b1_ref, w2_ref, b2_ref, o_ref, a_ref):
    h = jnp.dot(x_ref[...], w1_ref[...],
                preferred_element_type=jnp.float32) + b1_ref[...]
    h = jnp.maximum(h, 0.0)
    y = jnp.dot(h, w2_ref[...],
                preferred_element_type=jnp.float32) + b2_ref[...]
    o_ref[...] = y
    # Fused greedy action selection: first lane index achieving the row max.
    m = jnp.max(y, axis=-1, keepdims=True)
    lane = jax.lax.broadcasted_iota(jnp.int32, y.shape, 1).astype(jnp.float32)
    cand = jnp.where(y == m, lane, jnp.float32(y.shape[-1]))
    a_ref[...] = jnp.min(cand, axis=-1, keepdims=True).astype(jnp.int32)


def net_forward(x, params, *, tb=None, with_argmax=False):
    """Forward pass of Net.

    x: (B, 4) float32; params = prepare_params(w1, b1, w2, b2).
    Returns (B, 4) Q-values, or (q_values, greedy_actions (B, 1) int32)
    when with_argmax=True.
    """
    w1_t, b1, w2_t, b2 = params
    B = x.shape[0]

    # Tile selection: cover the batch in one grid step for typical DQN sizes;
    # split into two steps for very large batches so v7x's two TensorCores
    # both get work (harmless on v5e/v6e).  When TB < B it must be a multiple
    # of 8 (sublane constraint); TB == B is always legal.
    if tb is None:
        if B <= 1024:
            TB = B
        else:
            TB = min(_round_up(pl.cdiv(B, 2), 8), B)
    else:
        TB = min(tb, B)
        if TB < B:
            TB = min(_round_up(TB, 8), B)
    grid = (pl.cdiv(B, TB),)

    x_spec = pl.BlockSpec((TB, STATES_DIMENTION), lambda i: (i, 0))
    w1_spec = pl.BlockSpec((STATES_DIMENTION, HIDDEN), lambda i: (0, 0))
    b1_spec = pl.BlockSpec((1, HIDDEN), lambda i: (0, 0))
    w2_spec = pl.BlockSpec((HIDDEN, ACTIONS_DIMENTION), lambda i: (0, 0))
    b2_spec = pl.BlockSpec((1, ACTIONS_DIMENTION), lambda i: (0, 0))
    q_spec = pl.BlockSpec((TB, ACTIONS_DIMENTION), lambda i: (i, 0))

    out_shape = jax.ShapeDtypeStruct((B, ACTIONS_DIMENTION), jnp.float32)
    out_specs = q_spec
    kernel = _net_kernel
    if with_argmax:
        out_shape = (out_shape, jax.ShapeDtypeStruct((B, 1), jnp.int32))
        out_specs = (q_spec, pl.BlockSpec((TB, 1), lambda i: (i, 0)))
        kernel = _net_argmax_kernel

    return pl.pallas_call(
        kernel,
        out_shape=out_shape,
        grid=grid,
        in_specs=[x_spec, w1_spec, b1_spec, w2_spec, b2_spec],
        out_specs=out_specs,
        compiler_params=pltpu.CompilerParams(
            dimension_semantics=("parallel",)),
    )(x, w1_t, b1, w2_t, b2)


def _ref_forward(x, w1, b1, w2, b2):
    h = jnp.maximum(x @ w1.T + b1, 0.0)
    return h @ w2.T + b2


if __name__ == "__main__":
    key = jax.random.PRNGKey(0)
    k_x, k_w1, k_b1, k_w2, k_b2, k_x2 = jax.random.split(key, 6)

    # Parameter init mirroring the PyTorch module:
    #   weight ~ Normal(0, 0.2); bias ~ Uniform(-1/sqrt(in), 1/sqrt(in)).
    w1 = 0.2 * jax.random.normal(k_w1, (HIDDEN, STATES_DIMENTION), jnp.float32)
    b1 = jax.random.uniform(k_b1, (HIDDEN,), jnp.float32,
                            minval=-1.0 / jnp.sqrt(STATES_DIMENTION),
                            maxval=1.0 / jnp.sqrt(STATES_DIMENTION))
    w2 = 0.2 * jax.random.normal(k_w2, (ACTIONS_DIMENTION, HIDDEN), jnp.float32)
    b2 = jax.random.uniform(k_b2, (ACTIONS_DIMENTION,), jnp.float32,
                            minval=-1.0 / jnp.sqrt(HIDDEN),
                            maxval=1.0 / jnp.sqrt(HIDDEN))

    # Hoisted out of the per-step path: done once per weight update.
    params = prepare_params(w1, b1, w2, b2)
    fwd = jax.jit(net_forward, static_argnames=("tb", "with_argmax"))

    # 1) Action-selection sized call (B = 8, single tile, one device op).
    B = 8
    x = jax.random.normal(k_x, (B, STATES_DIMENTION), jnp.float32)
    q = jax.block_until_ready(fwd(x, params))
    ref = _ref_forward(x, w1, b1, w2, b2)
    assert q.shape == (B, ACTIONS_DIMENTION), q.shape
    assert jnp.allclose(q, ref, atol=1e-5, rtol=1e-5), "Q-value mismatch (B=8)"

    # 2) Replay-buffer sized call exercising the ragged batch grid (no pad /
    #    no slice) and the fused greedy-action output.
    B2 = 100
    x2 = jax.random.normal(k_x2, (B2, STATES_DIMENTION), jnp.float32)
    q2, a2 = fwd(x2, params, tb=64, with_argmax=True)   # grid = (2,), ragged tail
    q2, a2 = jax.block_until_ready((q2, a2))
    ref2 = _ref_forward(x2, w1, b1, w2, b2)
    assert q2.shape == (B2, ACTIONS_DIMENTION) and a2.shape == (B2, 1)
    assert jnp.allclose(q2, ref2, atol=1e-5, rtol=1e-5), "Q-value mismatch (B=100)"
    assert jnp.array_equal(a2[:, 0], jnp.argmax(ref2, axis=-1).astype(jnp.int32)), \
        "greedy action mismatch"

    # 3) Default auto-tiling path on the same large batch (single tile).
    q3 = jax.block_until_ready(fwd(x2, params))
    assert jnp.allclose(q3, ref2, atol=1e-5, rtol=1e-5), "Q-value mismatch (auto TB)"

    print("KERNEL_OK")
</pallas_src>

<mosaic_0001>
module attributes {stable_mosaic.version = 11 : i64} {
  func.func @_net_kernel(%arg0: i32, %arg1: memref<8x4xf32, #tpu.memory_space<vmem>>, %arg2: memref<4x50xf32, #tpu.memory_space<vmem>>, %arg3: memref<1x50xf32, #tpu.memory_space<vmem>>, %arg4: memref<50x4xf32, #tpu.memory_space<vmem>>, %arg5: memref<1x4xf32, #tpu.memory_space<vmem>>, %arg6: memref<8x4xf32, #tpu.memory_space<vmem>>) attributes {dimension_semantics = [#tpu.dimension_semantics<parallel>], iteration_bounds = array<i64: 1>, scalar_prefetch = 0 : i64, scratch_operands = 0 : i64, tpu.core_type = #tpu.core_type<tc>, window_params = [{transform_indices = @transform_0, window_bounds = array<i64: 8, 4>}, {pipeline_mode = #tpu.pipeline_mode<synchronous>, transform_indices = @transform_1, window_bounds = array<i64: 4, 50>}, {pipeline_mode = #tpu.pipeline_mode<synchronous>, transform_indices = @transform_2, window_bounds = array<i64: 1, 50>}, {pipeline_mode = #tpu.pipeline_mode<synchronous>, transform_indices = @transform_3, window_bounds = array<i64: 50, 4>}, {pipeline_mode = #tpu.pipeline_mode<synchronous>, transform_indices = @transform_4, window_bounds = array<i64: 1, 4>}, {transform_indices = @transform_5, window_bounds = array<i64: 8, 4>}]} {
    %c0 = arith.constant 0 : index
    %c0_0 = arith.constant 0 : index
    %0 = vector.load %arg1[%c0, %c0_0] : memref<8x4xf32, #tpu.memory_space<vmem>>, vector<8x4xf32>
    %c0_1 = arith.constant 0 : index
    %c0_2 = arith.constant 0 : index
    %1 = vector.load %arg2[%c0_1, %c0_2] : memref<4x50xf32, #tpu.memory_space<vmem>>, vector<4x50xf32>
    %cst = arith.constant dense<0.000000e+00> : vector<8x50xf32>
    %2 = tpu.matmul %0, %1, %cst {dimension_numbers = #tpu.dot_dimension_numbers<[1], [0], [0], [1], [0, 0, 1, 1], [], []>} : vector<8x4xf32>, vector<4x50xf32>, vector<8x50xf32> -> vector<8x50xf32>
    %c0_3 = arith.constant 0 : index
    %c0_4 = arith.constant 0 : index
    %3 = vector.load %arg3[%c0_3, %c0_4] : memref<1x50xf32, #tpu.memory_space<vmem>>, vector<1x50xf32>
    %4 = vector.broadcast %3 : vector<1x50xf32> to vector<8x50xf32>
    %5 = arith.addf %2, %4 : vector<8x50xf32>
    %cst_5 = arith.constant 0.000000e+00 : f32
    %6 = vector.broadcast %cst_5 : f32 to vector<8x50xf32>
    %7 = arith.maximumf %5, %6 : vector<8x50xf32>
    %c0_6 = arith.constant 0 : index
    %c0_7 = arith.constant 0 : index
    %8 = vector.load %arg4[%c0_6, %c0_7] : memref<50x4xf32, #tpu.memory_space<vmem>>, vector<50x4xf32>
    %cst_8 = arith.constant dense<0.000000e+00> : vector<8x4xf32>
    %9 = tpu.matmul %7, %8, %cst_8 {dimension_numbers = #tpu.dot_dimension_numbers<[1], [0], [0], [1], [0, 0, 1, 1], [], []>} : vector<8x50xf32>, vector<50x4xf32>, vector<8x4xf32> -> vector<8x4xf32>
    %c0_9 = arith.constant 0 : index
    %c0_10 = arith.constant 0 : index
    %10 = vector.load %arg5[%c0_9, %c0_10] : memref<1x4xf32, #tpu.memory_space<vmem>>, vector<1x4xf32>
    %11 = vector.broadcast %10 : vector<1x4xf32> to vector<8x4xf32>
    %12 = arith.addf %9, %11 : vector<8x4xf32>
    %c0_11 = arith.constant 0 : index
    %c0_12 = arith.constant 0 : index
    %13 = vector.load %arg6[%c0_11, %c0_12] : memref<8x4xf32, #tpu.memory_space<vmem>>, vector<8x4xf32>
    tpu.vector_store %arg6[%c0_11, %c0_12], %12 {strides = array<i32>} : memref<8x4xf32, #tpu.memory_space<vmem>>, vector<8x4xf32>,
    return
  }
  func.func @transform_0(%arg0: i32) -> (i32, i32) {
    %c0_i32 = arith.constant 0 : i32
    %c0_i32_0 = arith.constant 0 : i32
    return %arg0, %c0_i32 : i32, i32
  }
  func.func @transform_1(%arg0: i32) -> (i32, i32) {
    %c0_i32 = arith.constant 0 : i32
    %c0_i32_0 = arith.constant 0 : i32
    %c0_i32_1 = arith.constant 0 : i32
    return %c0_i32, %c0_i32_0 : i32, i32
  }
  func.func @transform_2(%arg0: i32) -> (i32, i32) {
    %c0_i32 = arith.constant 0 : i32
    %c0_i32_0 = arith.constant 0 : i32
    %c0_i32_1 = arith.constant 0 : i32
    return %c0_i32, %c0_i32_0 : i32, i32
  }
  func.func @transform_3(%arg0: i32) -> (i32, i32) {
    %c0_i32 = arith.constant 0 : i32
    %c0_i32_0 = arith.constant 0 : i32
    %c0_i32_1 = arith.constant 0 : i32
    return %c0_i32, %c0_i32_0 : i32, i32
  }
  func.func @transform_4(%arg0: i32) -> (i32, i32) {
    %c0_i32 = arith.constant 0 : i32
    %c0_i32_0 = arith.constant 0 : i32
    %c0_i32_1 = arith.constant 0 : i32
    return %c0_i32, %c0_i32_0 : i32, i32
  }
  func.func @transform_5(%arg0: i32) -> (i32, i32) {
    %c0_i32 = arith.constant 0 : i32
    %c0_i32_0 = arith.constant 0 : i32
    return %arg0, %c0_i32 : i32, i32
  }
}

</mosaic_0001>

<bundles_post_ra>
// kernel: net_forward.1
= control target key start
LH: loop header
LB: loop body
LE: loop exit
PB: predicated region body
PF: predicated region fallthrough
CT: control target
= control target key end

     0   :  { %vm30_vm0 = vcmask 1043456   ;;  %vm26_vm1 = vcmask 31744   ;;  %vm70_vm2 = vcmask 1041408   ;;  %vm66_vm3 = vcmask 408576   ;;  %s173_s1 = inlined_call_operand.vmem [shape: f32[4,50], index: 1, kind: input, shape index: {}]   ;;  %s174_s0 = inlined_call_operand.vmem [shape: f32[8,4], index: 0, kind: input, shape index: {}]   ;;  %s175_s3 = inlined_call_operand.vmem [shape: f32[50,4], index: 3, kind: input, shape index: {}]   ;;  %s176_s2 = inlined_call_operand.vmem [shape: f32[1,50], index: 2, kind: input, shape index: {}]   ;;  %s177_s4 = inlined_call_operand.vmem [shape: f32[1,4], index: 4, kind: input, shape index: {}]   ;;  %s178_s5 = inlined_call_operand.vmem [shape: f32[8,4], index: 5, kind: output, shape index: {}]  }
   0x1   :  { %v21_v0 = vld [vmem:[%s173_s1] sm:$0xf]  ;;  %v61_v2 = vld [vmem:[%s175_s3 + $0x30] sm:$0x3]  ;;  %v60_v3 = vld [vmem:[%s175_s3 + $0x28] sm:$0xff] }
   0x2   :  { %v20_v1 = vld [vmem:[%s174_s0] sm:$0xff]  ;;  %99 = vmatpush.msk.msra.mxu0 %vm30_vm0, %v21_v0  ;;  %101 = vmatpush.msk.msra.mxu1 %vm70_vm2, %v61_v2  ;;  %v58_v5 = vld [vmem:[%s175_s3 + $0x18] sm:$0xff]  ;;  %v57_v6 = vld [vmem:[%s175_s3 + $0x10] sm:$0xff] }
   0x3   :  { %100 = vmatmul.msk.f32.vlgmr.msra.gmra.mxu0 %vm26_vm1, %v20_v1  ;;  %v59_v4 = vld [vmem:[%s175_s3 + $0x20] sm:$0xff]  ;;  %v56_v7 = vld [vmem:[%s175_s3 + $0x8] sm:$0xff] }
   0x4   :  { %84 = vmatpush.msra.mxu1 %v60_v3  ;;  %v55_v8 = vld [vmem:[%s175_s3] sm:$0xff] }
   0x5   :  { %v103_v9 = vld [vmem:[%s176_s2] ss:$0 sm:$0xff] }
   0x6   :  { %85 = vmatpush.msra.mxu1 %v59_v4  ;;  %v104_v13 = vld [vmem:[%s177_s4] ss:$0 sm:$0xff] }
   0x8   :  { %86 = vmatpush.msra.mxu1 %v58_v5 }
   0xa   :  { %87 = vmatpush.msra.mxu1 %v57_v6 }
   0xc   :  { %88 = vmatpush.msra.mxu1 %v56_v7 }
   0xe   :  { %89 = vmatpush.msra.mxu1 %v55_v8 }
  0x80   :  { %v51_v10 = vpop.f32.mrf.mxu0 }
  0x81   :  { %v52_v11 = vadd.f32 %v103_v9, %v51_v10 }
  0x83   :  { %v54_v12 = vmax.f32 %v52_v11, 0.0 }
  0x85   :  { %102 = vmatmul.msk.f32.vlgmr.msra.gmra.mxu1 %vm66_vm3, %v54_v12 }
 0x102   :  { %v91_v14 = vpop.f32.mrf.mxu1 }
 0x103   :  { %v92_v15 = vadd.f32 %v104_v13, %v91_v14 }
 0x105   :  { %94 = vst.msk [vmem:[%s178_s5] sm:$0xff] %vm26_vm1, %v92_v15 }

</bundles_post_ra>
